<compile_context>
chip_gen: v7x
topology: tpu7x:2x2x1
jax: 0.10.0
libtpu: 0.0.40
codegen_flags: <defaults>
</compile_context>

<pallas_src>
import functools

import jax
import jax.numpy as jnp
from jax.experimental import pallas as pl
from jax.experimental.pallas import tpu as pltpu


def _cnn_classifier_kernel(ids_ref, emb_ref, wconv_ref, wcls_ref, bcls_ref,
                           out_ref, *, b_pad: int, sp: int, seq_len: int,
                           ksize: int, vocab: int, hidden: int):
    """ids_ref:   (NTOT, 1) int32 VMEM  (-1 sentinel rows => zero embedding)
       emb_ref:   (V, H)    f32  VMEM
       wconv_ref: (K, H, H) f32  VMEM   (Wk[cin, cout] = torch_w[cout, cin, k])
       wcls_ref:  (H, 128)  f32  VMEM   (classifier weight, zero-padded columns)
       bcls_ref:  (1, 128)  f32  VMEM   (classifier bias, zero-padded)
       out_ref:   (B_PAD, 128) f32 VMEM (lane/sublane-dense logits slab)
    """
    n = b_pad * sp                      # rows that carry conv outputs
    ntot = ids_ref.shape[0]             # n + tail rows (for the K-1 shifts)

    # --- fused embedding gather as a single one-hot MXU matmul -----------------
    ids = ids_ref[...]                                             # (NTOT, 1)
    vocab_iota = jax.lax.broadcasted_iota(jnp.int32, (ntot, vocab), 1)
    onehot = (vocab_iota == ids).astype(jnp.float32)               # (NTOT, V)
    xfull = jnp.dot(onehot, emb_ref[...],
                    preferred_element_type=jnp.float32)            # (NTOT, H)

    # --- Conv1d as K accumulated shifted matmuls (no im2col concat/reshape) ----
    # conv[r] = sum_k xfull[r + k] @ Wk ; per-batch blocks of SP rows are long
    # enough (SP >= S + K - 1) that valid output rows never cross a batch block.
    conv = jnp.zeros((n, hidden), jnp.float32)
    for k in range(ksize):
        conv = conv + jnp.dot(xfull[k:k + n, :], wconv_ref[k],
                              preferred_element_type=jnp.float32)  # (N, H)

    # --- masked max-pool over the sequence (== transpose + MaxPool1d(S)) -------
    row_iota = jax.lax.broadcasted_iota(jnp.int32, (n, hidden), 0)
    valid = (row_iota % sp) < seq_len
    conv = jnp.where(valid, conv, -jnp.inf)
    pooled = jnp.max(conv.reshape(b_pad, sp, hidden), axis=1)      # (B_PAD, H)

    # --- classifier: Linear(H, C) on a lane-dense 128-wide slab -----------------
    logits = jnp.dot(pooled, wcls_ref[...], preferred_element_type=jnp.float32)
    out_ref[...] = (logits + bcls_ref[...]).astype(out_ref.dtype)  # full-tile store


def torch_model_forward(ids, emb_table, conv_w_torch, cls_w_torch, cls_b, *,
                        kernel_size: int):
    """ids: (B, S) int32; returns logits (B, class_num)."""
    # torch Conv1d 'same'-length output only reproduced for odd kernel sizes.
    assert kernel_size % 2 == 1, "kernel_size must be odd to match padding=(K-1)//2"

    B, S = ids.shape
    V, H = emb_table.shape
    C = cls_w_torch.shape[0]
    K = kernel_size
    pad = (K - 1) // 2

    B_PAD = max(8, ((B + 7) // 8) * 8)            # sublane-dense batch/output
    SP = ((S + K - 1 + 7) // 8) * 8               # per-batch padded window, 8-aligned
    TAIL = max(8, ((K - 1 + 7) // 8) * 8)         # extra rows so shifts stay in bounds
    N = B_PAD * SP
    NTOT = N + TAIL
    C_PAD = 128                                    # lane-dense classifier/output width

    # ids layout: -1 sentinel everywhere except [b, pad : pad+S] of real batches.
    # -1 matches no vocab index -> zero one-hot row -> zero embedding row.
    ids_block = jnp.full((B_PAD, SP), -1, jnp.int32)
    ids_block = ids_block.at[:B, pad:pad + S].set(ids.astype(jnp.int32))
    ids_col = jnp.concatenate(
        [ids_block.reshape(-1), jnp.full((TAIL,), -1, jnp.int32)]).reshape(NTOT, 1)

    # Parameter re-layout (cheap, one-time glue):
    wconv = jnp.transpose(conv_w_torch, (2, 1, 0)).astype(jnp.float32)   # (K, Cin, Cout)
    wcls = jnp.zeros((H, C_PAD), jnp.float32).at[:, :C].set(cls_w_torch.T)
    bcls = jnp.zeros((1, C_PAD), jnp.float32).at[:, :C].set(cls_b.reshape(1, -1))

    kernel = functools.partial(_cnn_classifier_kernel, b_pad=B_PAD, sp=SP,
                               seq_len=S, ksize=K, vocab=V, hidden=H)

    out = pl.pallas_call(
        kernel,
        out_shape=jax.ShapeDtypeStruct((B_PAD, C_PAD), jnp.float32),
        in_specs=[
            pl.BlockSpec(memory_space=pltpu.MemorySpace.VMEM),  # ids (NTOT, 1)
            pl.BlockSpec(memory_space=pltpu.MemorySpace.VMEM),  # emb table (V, H)
            pl.BlockSpec(memory_space=pltpu.MemorySpace.VMEM),  # conv weight (K, H, H)
            pl.BlockSpec(memory_space=pltpu.MemorySpace.VMEM),  # cls weight (H, 128)
            pl.BlockSpec(memory_space=pltpu.MemorySpace.VMEM),  # cls bias (1, 128)
        ],
        out_specs=pl.BlockSpec(memory_space=pltpu.MemorySpace.VMEM),
    )(ids_col, emb_table.astype(jnp.float32), wconv, wcls, bcls)

    return out[:B, :C]


def _reference_forward(ids, emb_table, conv_w, cls_w, cls_b, kernel_size):
    """Pure-JAX reference of the torch forward (embedding -> conv1d -> maxpool -> linear)."""
    pad = (kernel_size - 1) // 2
    x = emb_table[ids]                                        # (B, S, H)
    B, S, H = x.shape
    xp = jnp.pad(x, ((0, 0), (pad, pad), (0, 0)))
    out = jnp.zeros((B, S, conv_w.shape[0]), jnp.float32)
    for k in range(kernel_size):
        out = out + jnp.einsum('bsc,oc->bso', xp[:, k:k + S, :], conv_w[:, :, k])
    pooled = jnp.max(out, axis=1)                             # (B, H)
    return pooled @ cls_w.T + cls_b


if __name__ == "__main__":
    # config (model_type="cnn" path of TorchModel; pooling_style="max")
    hidden_size = 32
    kernel_size = 3
    vocab_size = 30
    class_num = 5
    batch, seq = 2, 8

    key = jax.random.PRNGKey(0)
    k_emb, k_conv, k_cls_w, k_cls_b, k_ids = jax.random.split(key, 5)

    # deterministic parameter init (shapes follow the torch module's __init__)
    emb_table = 0.02 * jax.random.normal(k_emb, (vocab_size, hidden_size), jnp.float32)
    emb_table = emb_table.at[0].set(0.0)  # padding_idx=0

    conv_w = 0.1 * jax.random.normal(
        k_conv, (hidden_size, hidden_size, kernel_size), jnp.float32)  # torch (Cout, Cin, K)
    cls_w = 0.1 * jax.random.normal(k_cls_w, (class_num, hidden_size), jnp.float32)  # torch (C, H)
    cls_b = 0.1 * jax.random.normal(k_cls_b, (class_num,), jnp.float32)

    ids = jax.random.randint(k_ids, (batch, seq), 0, vocab_size, dtype=jnp.int32)

    y = torch_model_forward(ids, emb_table, conv_w, cls_w, cls_b,
                            kernel_size=kernel_size)
    jax.block_until_ready(y)
    assert y.shape == (batch, class_num), y.shape

    y_ref = _reference_forward(ids, emb_table, conv_w, cls_w, cls_b, kernel_size)
    assert jnp.allclose(y, y_ref, atol=2e-2, rtol=2e-2), (y, y_ref)

    # TODO(synk): "lstm"/"bert*" encoder variants of TorchModel (and pooling_style="avg")
    # are not implemented here; only the self-contained "cnn"/"max" path is reproduced.
    print("KERNEL_OK")
</pallas_src>

<mosaic_0001>
module attributes {stable_mosaic.version = 11 : i64} {
  func.func @_cnn_classifier_kernel(%arg0: memref<136x1xi32, #tpu.memory_space<vmem>>, %arg1: memref<30x32xf32, #tpu.memory_space<vmem>>, %arg2: memref<3x32x32xf32, #tpu.memory_space<vmem>>, %arg3: memref<32x128xf32, #tpu.memory_space<vmem>>, %arg4: memref<1x128xf32, #tpu.memory_space<vmem>>, %arg5: memref<8x128xf32, #tpu.memory_space<vmem>>) attributes {dimension_semantics = [], scalar_prefetch = 0 : i64, scratch_operands = 0 : i64, tpu.core_type = #tpu.core_type<tc>} {
    %c0 = arith.constant 0 : index
    %c0_0 = arith.constant 0 : index
    %0 = vector.load %arg0[%c0, %c0_0] : memref<136x1xi32, #tpu.memory_space<vmem>>, vector<136x1xi32>
    %1 = tpu.iota {dimensions = array<i32: 1>} : vector<136x30xi32>
    %2 = vector.broadcast %0 : vector<136x1xi32> to vector<136x30xi32>
    %3 = arith.cmpi eq, %1, %2 : vector<136x30xi32>
    %4 = arith.extui %3 : vector<136x30xi1> to vector<136x30xi32>
    %5 = arith.sitofp %4 : vector<136x30xi32> to vector<136x30xf32>
    %c0_1 = arith.constant 0 : index
    %c0_2 = arith.constant 0 : index
    %6 = vector.load %arg1[%c0_1, %c0_2] : memref<30x32xf32, #tpu.memory_space<vmem>>, vector<30x32xf32>
    %cst = arith.constant dense<0.000000e+00> : vector<136x32xf32>
    %7 = tpu.matmul %5, %6, %cst {dimension_numbers = #tpu.dot_dimension_numbers<[1], [0], [0], [1], [0, 0, 1, 1], [], []>} : vector<136x30xf32>, vector<30x32xf32>, vector<136x32xf32> -> vector<136x32xf32>
    %cst_3 = arith.constant 0.000000e+00 : f32
    %8 = vector.broadcast %cst_3 : f32 to vector<128x32xf32>
    %9 = vector.extract_strided_slice %7 {offsets = [0, 0], sizes = [128, 32], strides = [1, 1]} : vector<136x32xf32> to vector<128x32xf32>
    %c0_4 = arith.constant 0 : index
    %c0_5 = arith.constant 0 : index
    %c0_6 = arith.constant 0 : index
    %10 = vector.load %arg2[%c0_4, %c0_5, %c0_6] : memref<3x32x32xf32, #tpu.memory_space<vmem>>, vector<1x32x32xf32>
    %11 = vector.shape_cast %10 : vector<1x32x32xf32> to vector<32x32xf32>
    %cst_7 = arith.constant dense<0.000000e+00> : vector<128x32xf32>
    %12 = tpu.matmul %9, %11, %cst_7 {dimension_numbers = #tpu.dot_dimension_numbers<[1], [0], [0], [1], [0, 0, 1, 1], [], []>} : vector<128x32xf32>, vector<32x32xf32>, vector<128x32xf32> -> vector<128x32xf32>
    %13 = arith.addf %8, %12 : vector<128x32xf32>
    %14 = vector.extract_strided_slice %7 {offsets = [1, 0], sizes = [128, 32], strides = [1, 1]} : vector<136x32xf32> to vector<128x32xf32>
    %c1 = arith.constant 1 : index
    %c0_8 = arith.constant 0 : index
    %c0_9 = arith.constant 0 : index
    %15 = vector.load %arg2[%c1, %c0_8, %c0_9] : memref<3x32x32xf32, #tpu.memory_space<vmem>>, vector<1x32x32xf32>
    %16 = vector.shape_cast %15 : vector<1x32x32xf32> to vector<32x32xf32>
    %cst_10 = arith.constant dense<0.000000e+00> : vector<128x32xf32>
    %17 = tpu.matmul %14, %16, %cst_10 {dimension_numbers = #tpu.dot_dimension_numbers<[1], [0], [0], [1], [0, 0, 1, 1], [], []>} : vector<128x32xf32>, vector<32x32xf32>, vector<128x32xf32> -> vector<128x32xf32>
    %18 = arith.addf %13, %17 : vector<128x32xf32>
    %19 = vector.extract_strided_slice %7 {offsets = [2, 0], sizes = [128, 32], strides = [1, 1]} : vector<136x32xf32> to vector<128x32xf32>
    %c2 = arith.constant 2 : index
    %c0_11 = arith.constant 0 : index
    %c0_12 = arith.constant 0 : index
    %20 = vector.load %arg2[%c2, %c0_11, %c0_12] : memref<3x32x32xf32, #tpu.memory_space<vmem>>, vector<1x32x32xf32>
    %21 = vector.shape_cast %20 : vector<1x32x32xf32> to vector<32x32xf32>
    %cst_13 = arith.constant dense<0.000000e+00> : vector<128x32xf32>
    %22 = tpu.matmul %19, %21, %cst_13 {dimension_numbers = #tpu.dot_dimension_numbers<[1], [0], [0], [1], [0, 0, 1, 1], [], []>} : vector<128x32xf32>, vector<32x32xf32>, vector<128x32xf32> -> vector<128x32xf32>
    %23 = arith.addf %18, %22 : vector<128x32xf32>
    %24 = tpu.iota {dimensions = array<i32: 0>} : vector<128x32xi32>
    %c16_i32 = arith.constant 16 : i32
    %c0_i32 = arith.constant 0 : i32
    %25 = arith.cmpi eq, %c16_i32, %c0_i32 : i32
    %c1_i32 = arith.constant 1 : i32
    %26 = arith.select %25, %c1_i32, %c16_i32 : i32
    %27 = vector.broadcast %26 : i32 to vector<128x32xi32>
    %28 = arith.remsi %24, %27 : vector<128x32xi32>
    %c0_i32_14 = arith.constant 0 : i32
    %29 = vector.broadcast %c0_i32_14 : i32 to vector<128x32xi32>
    %30 = arith.cmpi ne, %28, %29 : vector<128x32xi32>
    %c0_i32_15 = arith.constant 0 : i32
    %31 = vector.broadcast %c0_i32_15 : i32 to vector<128x32xi32>
    %32 = arith.cmpi slt, %28, %31 : vector<128x32xi32>
    %c0_i32_16 = arith.constant 0 : i32
    %33 = arith.cmpi slt, %26, %c0_i32_16 : i32
    %34 = vector.broadcast %33 : i1 to vector<128x32xi1>
    %35 = vector.broadcast %34 : vector<128x32xi1> to vector<128x32xi1>
    %36 = arith.xori %32, %35 : vector<128x32xi1>
    %37 = arith.andi %36, %30 : vector<128x32xi1>
    %38 = vector.broadcast %26 : i32 to vector<128x32xi32>
    %39 = arith.addi %28, %38 : vector<128x32xi32>
    %40 = arith.select %37, %39, %28 : vector<128x32xi1>, vector<128x32xi32>
    %c8_i32 = arith.constant 8 : i32
    %41 = vector.broadcast %c8_i32 : i32 to vector<128x32xi32>
    %42 = arith.cmpi slt, %40, %41 : vector<128x32xi32>
    %cst_17 = arith.constant 0xFF800000 : f32
    %43 = vector.broadcast %cst_17 : f32 to vector<128x32xf32>
    %44 = arith.select %42, %23, %43 : vector<128x32xi1>, vector<128x32xf32>
    %45 = vector.shape_cast %44 : vector<128x32xf32> to vector<8x16x32xf32>
    %cst_18 = arith.constant dense<0xFF800000> : vector<8x32xf32>
    %46 = vector.multi_reduction <maximumf>, %45, %cst_18 [1] : vector<8x16x32xf32> to vector<8x32xf32>
    %c0_19 = arith.constant 0 : index
    %c0_20 = arith.constant 0 : index
    %47 = vector.load %arg3[%c0_19, %c0_20] : memref<32x128xf32, #tpu.memory_space<vmem>>, vector<32x128xf32>
    %cst_21 = arith.constant dense<0.000000e+00> : vector<8x128xf32>
    %48 = tpu.matmul %46, %47, %cst_21 {dimension_numbers = #tpu.dot_dimension_numbers<[1], [0], [0], [1], [0, 0, 1, 1], [], []>} : vector<8x32xf32>, vector<32x128xf32>, vector<8x128xf32> -> vector<8x128xf32>
    %c0_22 = arith.constant 0 : index
    %c0_23 = arith.constant 0 : index
    %49 = vector.load %arg4[%c0_22, %c0_23] : memref<1x128xf32, #tpu.memory_space<vmem>>, vector<1x128xf32>
    %50 = vector.broadcast %49 : vector<1x128xf32> to vector<8x128xf32>
    %51 = arith.addf %48, %50 : vector<8x128xf32>
    %c0_24 = arith.constant 0 : index
    %c0_25 = arith.constant 0 : index
    %52 = vector.load %arg5[%c0_24, %c0_25] : memref<8x128xf32, #tpu.memory_space<vmem>>, vector<8x128xf32>
    tpu.vector_store %arg5[%c0_24, %c0_25], %51 {strides = array<i32>} : memref<8x128xf32, #tpu.memory_space<vmem>>, vector<8x128xf32>,
    return
  }
}

</mosaic_0001>

<bundles_post_ra>
// kernel: tpu_custom_call.1
= control target key start
LH: loop header
LB: loop body
LE: loop exit
PB: predicated region body
PF: predicated region fallthrough
CT: control target
= control target key end

     0   :  { %10 = vsyncpa [#allocation3], 0  ;;  %s2363_s0 = inlined_call_operand.vmem [shape: s32[136,1], index: 0, kind: input, shape index: {}]   ;;  %s2364_s1 = inlined_call_operand.vmem [shape: f32[30,32], index: 1, kind: input, shape index: {}]   ;;  %s2365_s2 = inlined_call_operand.vmem [shape: f32[3,32,32], index: 2, kind: input, shape index: {}]   ;;  %s2366_s3 = inlined_call_operand.hbm [shape: f32[32,128], index: 3, kind: input, shape index: {}]   ;;  %s2367_s4 = inlined_call_operand.vmem [shape: f32[1,128], index: 4, kind: input, shape index: {}]   ;;  %s2368_s5 = inlined_call_operand.hbm [shape: f32[8,128], index: 5, kind: output, shape index: {}]  }
   0x1   :  { %11 = vsyncpa [#allocation4], 0  ;;  %s1920_s18 = smov [#allocation2]   ;;  %s1872_s22 = scalar_lea.hbm %s2366_s3, 512 }
   0x2   :  { %s23_s19 = sshll.u32 %s1920_s18, 4  ;;  %p1873_p0 = scmp.ne.s32.totalorder %s2366_s3, %s1872_s22  ;;  %s24_s19 = int_to_ptr.vmem [resolvable:$true] %s23_s19 }
   0x3   :  { %p1876_p1 = scmp.lt.u32.totalorder %s1872_s22, %s2366_s3 }
   0x5   :  { %p1878_p2 = pnand %p1876_p1, %p1873_p0 }
   0x7   :  { %1881 = shalt.err (!%p1878_p2)
}
   0x8   :  { %s1882_s27 = scalar_lea.vmem %s24_s19, 512  ;;  %p1887_p4 = scmp.lt.s32.totalorder %s24_s19, %s24_s19 }
   0x9   :  { %p1883_p3 = scmp.ne.s32.totalorder %s24_s19, %s1882_s27  ;;  %p1888_p5 = scmp.lt.s32.totalorder %s1882_s27, %s1882_s27 }
   0xb   :  { %p1889_p6 = por %p1888_p5, %p1887_p4 }
   0xd   :  { %p1890_p7 = pnand %p1889_p6, %p1883_p3 }
   0xf   :  { %1893 = shalt.err (!%p1890_p7)
}
  0x10   :  { %s1921_s28 = smov 128   ;;  %s1922_s29 = smov 8  }
  0x11   :  { %29 = dma.hbm_to_vmem [thread:$0]  %s2366_s3, 512, %s24_s19, [#allocation3], %s1921_s28, %s1921_s28, %s1922_s29  }
  0x12   :  { %1916 = dma.done.wait [#allocation3], 512  }
  0x13   :  { %1917 = vsyncadd [#allocation3], 4294966784  ;;  %v1923_v0 = vmov 0   ;;  %v1924_v1 = vmov 0.0|0.0   ;;  %v37_v2 = vld [vmem:[%s2363_s0 + $0x10] sm:$0xff]  ;;  %v35_v3 = vld [vmem:[%s2363_s0] sm:$0xff]  ;;  %v52_v26 = vlaneseq }
  0x14   :  { %1871 = vset.pattern.permute.xlu1 %v1923_v0  ;;  %1870 = vset.pattern.permute.xlu0 %v1923_v0  ;;  %v38_v4 = vld [vmem:[%s2363_s0 + $0x18] sm:$0xff]  ;;  %v36_v5 = vld [vmem:[%s2363_s0 + $0x8] sm:$0xff]  ;;  %vm1925_vm0 = vmmov 0   ;;  %v1926_v6 = vmov 0.0   ;;  %v156_v7 = vld [vmem:[%s2364_s1] sm:$0xff]  ;;  %vm212_vm1 = vcmask 1045504  }
  0x15   :  { %1791 = vmatprep.subr.bf16.mxu0 %v1924_v1  ;;  %61 = vperm.xlu1 %1871, %v37_v2   ;;  %v40_v8 = vld [vmem:[%s2363_s0 + $0x28] sm:$0xff]  ;;  %v39_v9 = vld [vmem:[%s2363_s0 + $0x20] sm:$0xff]  ;;  %v158_v12 = vld [vmem:[%s2364_s1 + $0x10] sm:$0xff]  ;;  %vm1927_vm2 = vmmov 1   ;;  %v2039_v27 = vand.u32 127, %v52_v26  ;;  %vm160_vm4 = vcmask 244736  }
  0x16   :  { %55 = vperm.xlu0 %1870, %v35_v3   ;;  %1633 = vmatprep.mubr.msk.f32.mxu0 %vm1925_vm0, %v1926_v6  ;;  %v157_v10 = vld [vmem:[%s2364_s1 + $0x8] sm:$0xff]  ;;  %v159_v13 = vld [vmem:[%s2364_s1 + $0x18] sm:$0x3f]  ;;  %v41_v15 = vld [vmem:[%s2363_s0 + $0x30] sm:$0xff]  ;;  %s1928_s18 = smov [#allocation5]  }
  0x17   :  { %v1792_v11 = vpack.c.bf16 %v157_v10, %v156_v7  ;;  %v42_v14 = vld [vmem:[%s2363_s0 + $0x38] sm:$0xff]  ;;  %v1795_v16 = vpack.c.bf16 %v159_v13, %v158_v12  ;;  %vm1796_vm3 = vmpackc.low %vm212_vm1, %vm1927_vm2  ;;  %v44_v17 = vld [vmem:[%s2363_s0 + $0x48] sm:$0xff]  ;;  %s1437_s19 = sshll.u32 %s1928_s18, 4  ;;  %s1438_s19 = int_to_ptr.vmem [resolvable:$true] %s1437_s19 }
  0x18   :  { %v43_v18 = vld [vmem:[%s2363_s0 + $0x40] sm:$0xff]  ;;  %v46_v19 = vld [vmem:[%s2363_s0 + $0x58] sm:$0xff]  ;;  %v45_v20 = vld [vmem:[%s2363_s0 + $0x50] sm:$0xff]  ;;  %s1894_s20 = scalar_lea.vmem %s1438_s19, 128  ;;  %p1899_p9 = scmp.lt.s32.totalorder %s1438_s19, %s1438_s19 }
  0x19   :  { %64 = vperm.xlu1 %1871, %v38_v4   ;;  %1793 = vmatpush3.bf16.msra.mxu0 %v1792_v11  ;;  %v48_v21 = vld [vmem:[%s2363_s0 + $0x68] sm:$0xff]  ;;  %v47_v22 = vld [vmem:[%s2363_s0 + $0x60] sm:$0xff]  ;;  %v50_v23 = vld [vmem:[%s2363_s0 + $0x78] sm:$0xff]  ;;  %p1895_p8 = scmp.ne.s32.totalorder %s1438_s19, %s1894_s20  ;;  %p1900_p10 = scmp.lt.s32.totalorder %s1894_s20, %s1894_s20 }
  0x1a   :  { %58 = vperm.xlu0 %1870, %v36_v5   ;;  %1794 = vmatprep.subr.bf16.mxu0 %v1924_v1  ;;  %v49_v24 = vld [vmem:[%s2363_s0 + $0x70] sm:$0xff]  ;;  %v51_v25 = vld [vmem:[%s2363_s0 + $0x80] sm:$0xff]  ;;  %v1482_v63 = vld [vmem:[%s2365_s2 + $0x28] sm:$0xff] }
  0x1b   :  { %v1481_v62 = vld [vmem:[%s2365_s2 + $0x20] sm:$0xff]  ;;  %v1483_v2 = vld [vmem:[%s2365_s2 + $0x30] sm:$0xff]  ;;  %v1484_v3 = vld [vmem:[%s2365_s2 + $0x38] sm:$0xff]  ;;  %p1901_p11 = por %p1900_p10, %p1899_p9 }
  0x1c   :  { %v1798_v0 = vpack.c.bf16 %v1482_v63, %v1481_v62  ;;  %v1802_v4 = vpack.c.bf16 %v1484_v3, %v1483_v2  ;;  %v366_v5 = vld [vmem:[%s2365_s2] sm:$0xff]  ;;  %v367_v7 = vld [vmem:[%s2365_s2 + $0x8] sm:$0xff] }
  0x1d   :  { %70 = vperm.xlu1 %1871, %v40_v8   ;;  %1797 = vmatpush3.bf16.msk.msra.mxu0 %vm1796_vm3, %v1795_v16  ;;  %v2143_v8 = vpack.c.bf16 %v367_v7, %v366_v5  ;;  %v1517_v62 = vld [vmem:[%s2365_s2 + $0x40] sm:$0xff]  ;;  %v1518_v63 = vld [vmem:[%s2365_s2 + $0x48] sm:$0xff]  ;;  %p1902_p12 = pnand %p1901_p11, %p1895_p8 }
  0x1e   :  { %67 = vperm.xlu0 %1870, %v39_v9   ;;  %1799 = vmatprep.subr.bf16.mxu0 %v1798_v0  ;;  %v1814_v7 = vpack.c.bf16 %v1518_v63, %v1517_v62 }
  0x1f   :  { %1828 = vmatprep.subr.bf16.mxu1 %v1798_v0 }
  0x20   :  { %1830 = vmatpush3.bf16.msra.mxu1 %v1798_v0 }
  0x21   :  { %76 = vperm.xlu1 %1871, %v42_v14   ;;  %1829 = vmatprep.subr.bf16.mxu1 %v1802_v4 }
  0x22   :  { %73 = vperm.xlu0 %1870, %v41_v15  }
  0x24   :  { %1831 = vmatpush3.bf16.msra.mxu1 %v1802_v4 }
  0x25   :  { %82 = vperm.xlu1 %1871, %v44_v17   ;;  %1807 = vmatprep.subr.bf16.mxu1 %v2143_v8 }
  0x26   :  { %79 = vperm.xlu0 %1870, %v43_v18  }
  0x29   :  { %88 = vperm.xlu1 %1871, %v46_v19  }
  0x2a   :  { %85 = vperm.xlu0 %1870, %v45_v20  }
  0x2d   :  { %94 = vperm.xlu1 %1871, %v48_v21  }
  0x2e   :  { %91 = vperm.xlu0 %1870, %v47_v22  }
  0x31   :  { %100 = vperm.xlu1 %1871, %v50_v23  }
  0x32   :  { %97 = vperm.xlu0 %1870, %v49_v24  }
  0x36   :  { %103 = vperm.xlu0 %1870, %v51_v25  }
  0x94   :  { %v62_v30 = vpop.permute.xlu1 %61 }
  0x95   :  { %v56_v28 = vpop.permute.xlu0 %55  ;;  %vm107_vm6 = vcmp.eq.s32.totalorder %v2039_v27, %v62_v30 }
  0x96   :  { %vm105_vm5 = vcmp.eq.s32.totalorder %v2039_v27, %v56_v28  ;;  %v1448_v33 = vsel %vm107_vm6, 1.0, %v1926_v6 }
  0x97   :  { %v1446_v29 = vsel %vm105_vm5, 1.0, %v1926_v6 }
  0x98   :  { %1634 = vmatmul.mubr.msk.f32.vlgmr.msra.gmra.mrb[0].mxu0 %vm160_vm4, %v1446_v29  ;;  %v65_v34 = vpop.permute.xlu1 %64 }
  0x99   :  { %v59_v31 = vpop.permute.xlu0 %58  ;;  %1636 = vmatprep.mubr.msk.f32.mxu0 %vm1925_vm0, %v1926_v6  ;;  %vm108_vm8 = vcmp.eq.s32.totalorder %v2039_v27, %v65_v34  ;;  %1801 = vmatpush3.bf16.msra.mxu0 %v1798_v0 }
  0x9a   :  { %vm106_vm7 = vcmp.eq.s32.totalorder %v2039_v27, %v59_v31  ;;  %v1449_v36 = vsel %vm108_vm8, 1.0, %v1926_v6  ;;  %1803 = vmatprep.subr.bf16.mxu0 %v1802_v4 }
  0x9b   :  { %v1447_v32 = vsel %vm106_vm7, 1.0, %v1926_v6 }
  0x9c   :  { %1637 = vmatmul.mubr.msk.f32.gmra.mrb[2].mxu0 %vm160_vm4, %v1447_v32  ;;  %v71_v37 = vpop.permute.xlu1 %70 }
  0x9d   :  { %1639 = vmatprep.mubr.msk.f32.mxu0 %vm1925_vm0, %v1926_v6  ;;  %v68_v35 = vpop.permute.xlu0 %67  ;;  %vm110_vm10 = vcmp.eq.s32.totalorder %v2039_v27, %v71_v37  ;;  %1805 = vmatpush3.bf16.msra.mxu0 %v1802_v4 }
  0x9e   :  { %vm109_vm9 = vcmp.eq.s32.totalorder %v2039_v27, %v68_v35  ;;  %v1451_v40 = vsel %vm110_vm10, 1.0, %v1926_v6  ;;  %1822 = vmatprep.subr.bf16.mxu0 %v1924_v1  ;;  %vm1348_vm10 = vcmask 1043459  }
  0x9f   :  { %v1450_v38 = vsel %vm109_vm9, 1.0, %v1926_v6  ;;  %vm426_vm9 = vcmask 261120  }
  0xa0   :  { %1640 = vmatmul.mubr.msk.f32.gmra.mrb[4].mxu0 %vm160_vm4, %v1448_v33  ;;  %v77_v41 = vpop.permute.xlu1 %76 }
  0xa1   :  { %1642 = vmatprep.mubr.msk.f32.mxu0 %vm1925_vm0, %v1926_v6  ;;  %v74_v39 = vpop.permute.xlu0 %73  ;;  %vm112_vm12 = vcmp.eq.s32.totalorder %v2039_v27, %v77_v41 }
  0xa2   :  { %vm111_vm11 = vcmp.eq.s32.totalorder %v2039_v27, %v74_v39  ;;  %v1453_v44 = vsel %vm112_vm12, 1.0, %v1926_v6  ;;  %vm1352_vm12 = vcmask 1045509  }
  0xa3   :  { %v1452_v42 = vsel %vm111_vm11, 1.0, %v1926_v6  ;;  %vm1350_vm11 = vcmask 1044484  }
  0xa4   :  { %1643 = vmatmul.mubr.msk.f32.gmra.mrb[6].mxu0 %vm160_vm4, %v1449_v36  ;;  %v83_v45 = vpop.permute.xlu1 %82 }
  0xa5   :  { %1645 = vmatprep.mubr.msk.f32.mxu0 %vm1925_vm0, %v1926_v6  ;;  %v80_v43 = vpop.permute.xlu0 %79  ;;  %vm114_vm14 = vcmp.eq.s32.totalorder %v2039_v27, %v83_v45 }
  0xa6   :  { %vm113_vm13 = vcmp.eq.s32.totalorder %v2039_v27, %v80_v43  ;;  %v1455_v48 = vsel %vm114_vm14, 1.0, %v1926_v6  ;;  %vm1356_vm14 = vcmask 1047559  }
  0xa7   :  { %v1454_v46 = vsel %vm113_vm13, 1.0, %v1926_v6  ;;  %vm1354_vm13 = vcmask 1046534  }
  0xa8   :  { %1646 = vmatmul.mubr.msk.f32.gmra.mrb[8].mxu0 %vm160_vm4, %v1450_v38  ;;  %v89_v49 = vpop.permute.xlu1 %88 }
  0xa9   :  { %1648 = vmatprep.mubr.msk.f32.mxu0 %vm1925_vm0, %v1926_v6  ;;  %v86_v47 = vpop.permute.xlu0 %85  ;;  %vm116_vm2 = vcmp.eq.s32.totalorder %v2039_v27, %v89_v49 }
  0xaa   :  { %vm115_vm15 = vcmp.eq.s32.totalorder %v2039_v27, %v86_v47  ;;  %v1457_v52 = vsel %vm116_vm2, 1.0, %v1926_v6 }
  0xab   :  { %v1456_v50 = vsel %vm115_vm15, 1.0, %v1926_v6 }
  0xac   :  { %1649 = vmatmul.mubr.msk.f32.gmra.mrb[10].mxu0 %vm160_vm4, %v1451_v40  ;;  %v95_v53 = vpop.permute.xlu1 %94 }
  0xad   :  { %1651 = vmatprep.mubr.msk.f32.mxu0 %vm1925_vm0, %v1926_v6  ;;  %v92_v51 = vpop.permute.xlu0 %91  ;;  %vm118_vm5 = vcmp.eq.s32.totalorder %v2039_v27, %v95_v53 }
  0xae   :  { %vm117_vm3 = vcmp.eq.s32.totalorder %v2039_v27, %v92_v51  ;;  %v1459_v56 = vsel %vm118_vm5, 1.0, %v1926_v6 }
  0xaf   :  { %v1458_v54 = vsel %vm117_vm3, 1.0, %v1926_v6 }
  0xb0   :  { %1652 = vmatmul.mubr.msk.f32.gmra.mrb[12].mxu0 %vm160_vm4, %v1452_v42  ;;  %v101_v57 = vpop.permute.xlu1 %100 }
  0xb1   :  { %1654 = vmatprep.mubr.msk.f32.mxu0 %vm1925_vm0, %v1926_v6  ;;  %v98_v55 = vpop.permute.xlu0 %97  ;;  %vm120_vm7 = vcmp.eq.s32.totalorder %v2039_v27, %v101_v57 }
  0xb2   :  { %vm119_vm6 = vcmp.eq.s32.totalorder %v2039_v27, %v98_v55  ;;  %v1461_v60 = vsel %vm120_vm7, 1.0, %v1926_v6  ;;  %v369_v55 = vld [vmem:[%s2365_s2 + $0x18] sm:$0xff] }
  0xb3   :  { %v1460_v58 = vsel %vm119_vm6, 1.0, %v1926_v6 }
  0xb4   :  { %1655 = vmatmul.mubr.msk.f32.gmra.mrb[14].mxu0 %vm160_vm4, %v1453_v44 }
  0xb5   :  { %1657 = vmatprep.mubr.msk.f32.mxu0 %vm1925_vm0, %v1926_v6  ;;  %v104_v59 = vpop.permute.xlu0 %103 }
  0xb6   :  { %vm121_vm8 = vcmp.eq.s32.totalorder %v2039_v27, %v104_v59 }
  0xb7   :  { %v1462_v61 = vsel %vm121_vm8, 1.0, %v1926_v6 }
  0xb8   :  { %1658 = vmatmul.mubr.msk.f32.gmra.mrb[16].mxu0 %vm160_vm4, %v1454_v46 }
  0xb9   :  { %1660 = vmatprep.mubr.msk.f32.mxu0 %vm1925_vm0, %v1926_v6 }
  0xbc   :  { %1661 = vmatmul.mubr.msk.f32.gmra.mrb[18].mxu0 %vm160_vm4, %v1455_v48 }
  0xbd   :  { %1663 = vmatprep.mubr.msk.f32.mxu0 %vm1925_vm0, %v1926_v6 }
  0xc0   :  { %1664 = vmatmul.mubr.msk.f32.gmra.mrb[20].mxu0 %vm160_vm4, %v1456_v50 }
  0xc1   :  { %1666 = vmatprep.mubr.msk.f32.mxu0 %vm1925_vm0, %v1926_v6 }
  0xc4   :  { %1667 = vmatmul.mubr.msk.f32.gmra.mrb[22].mxu0 %vm160_vm4, %v1457_v52 }
  0xc5   :  { %1669 = vmatprep.mubr.msk.f32.mxu0 %vm1925_vm0, %v1926_v6 }
  0xc8   :  { %1670 = vmatmul.mubr.msk.f32.gmra.mrb[24].mxu0 %vm160_vm4, %v1458_v54  ;;  %v368_v54 = vld [vmem:[%s2365_s2 + $0x10] sm:$0xff] }
  0xc9   :  { %1672 = vmatprep.mubr.msk.f32.mxu0 %vm1925_vm0, %v1926_v6 }
  0xcc   :  { %1673 = vmatmul.mubr.msk.f32.gmra.mrb[26].mxu0 %vm160_vm4, %v1459_v56 }
  0xcd   :  { %1675 = vmatprep.mubr.msk.f32.mxu0 %vm1925_vm0, %v1926_v6 }
  0xd0   :  { %1676 = vmatmul.mubr.msk.f32.gmra.mrb[28].mxu0 %vm160_vm4, %v1460_v58 }
  0xd1   :  { %1678 = vmatprep.mubr.msk.f32.mxu0 %vm1925_vm0, %v1926_v6 }
  0xd4   :  { %1679 = vmatmul.mubr.msk.f32.gmra.mrb[30].mxu0 %vm160_vm4, %v1461_v60  ;;  %v1810_v60 = vpack.c.bf16 %v369_v55, %v368_v54 }
  0xd5   :  { %1681 = vmatprep.mubr.msk.f32.mxu0 %vm1925_vm0, %v1926_v6 }
  0xd8   :  { %1682 = vmatmul.mubr.msk.f32.gmra.mrb[32].mxu0 %vm160_vm4, %v1462_v61  ;;  %vm392_vm4 = vcmask 1046528  }
 0x16b   :  { %v2146_v9 = vpop.f32.mrb[0].mxu0 }
 0x16c   :  { %v1635_v10 = vpop.f32.mrb[1].mxu0  ;;  %v393_v12 = vrot.slane %v2146_v9, 1  ;;  %v786_v13 = vrot.slane %v2146_v9, 2 }
 0x16f   :  { %v2148_v11 = vpop.f32.mrb[2].mxu0 }
 0x170   :  { %v394_v14 = vrot.slane %v2148_v11, 1  ;;  %v787_v15 = vrot.slane %v2148_v11, 2  ;;  %v1638_v16 = vpop.f32.mrb[3].mxu0 }
 0x172   :  { %v395_v17 = vsel %vm392_vm4, %v393_v12, %v394_v14  ;;  %v2156_v18 = vsel %vm212_vm1, %v786_v13, %v787_v15 }
 0x173   :  { %v2158_v19 = vpop.f32.mrb[4].mxu0  ;;  %1692 = vmatprep.mubr.msk.f32.mxu0 %vm426_vm9, %v395_v17 }
 0x174   :  { %v396_v20 = vrot.slane %v2158_v19, 1  ;;  %v789_v21 = vrot.slane %v2158_v19, 2  ;;  %v1641_v22 = vpop.f32.mrb[5].mxu0 }
 0x176   :  { %v397_v23 = vsel %vm392_vm4, %v394_v14, %v396_v20  ;;  %v2165_v24 = vsel %vm212_vm1, %v787_v15, %v789_v21 }
 0x177   :  { %v2167_v25 = vpop.f32.mrb[6].mxu0  ;;  %1693 = vmatmul.mubr.msk.f32.vlgmr.msra.gmra.mrb[34].mxu0 %vm426_vm9, %v397_v23 }
 0x178   :  { %v398_v26 = vrot.slane %v2167_v25, 1  ;;  %v791_v27 = vrot.slane %v2167_v25, 2  ;;  %v1644_v28 = vpop.f32.mrb[7].mxu0 }
 0x17a   :  { %v399_v29 = vsel %vm392_vm4, %v396_v20, %v398_v26  ;;  %v2174_v30 = vsel %vm212_vm1, %v789_v21, %v791_v27 }
 0x17b   :  { %v2176_v31 = vpop.f32.mrb[8].mxu0  ;;  %1695 = vmatprep.mubr.msk.f32.mxu0 %vm426_vm9, %v399_v29 }
 0x17c   :  { %v400_v32 = vrot.slane %v2176_v31, 1  ;;  %v793_v33 = vrot.slane %v2176_v31, 2  ;;  %v1647_v34 = vpop.f32.mrb[9].mxu0 }
 0x17e   :  { %v401_v35 = vsel %vm392_vm4, %v398_v26, %v400_v32  ;;  %v2183_v36 = vsel %vm212_vm1, %v791_v27, %v793_v33 }
 0x17f   :  { %v2185_v37 = vpop.f32.mrb[10].mxu0  ;;  %1696 = vmatmul.mubr.msk.f32.gmra.mrb[36].mxu0 %vm426_vm9, %v401_v35 }
 0x180   :  { %v402_v38 = vrot.slane %v2185_v37, 1  ;;  %v795_v39 = vrot.slane %v2185_v37, 2  ;;  %v1650_v40 = vpop.f32.mrb[11].mxu0 }
 0x182   :  { %v403_v41 = vsel %vm392_vm4, %v400_v32, %v402_v38  ;;  %v2192_v42 = vsel %vm212_vm1, %v793_v33, %v795_v39 }
 0x183   :  { %v2194_v43 = vpop.f32.mrb[12].mxu0  ;;  %1698 = vmatprep.mubr.msk.f32.mxu0 %vm426_vm9, %v403_v41 }
 0x184   :  { %v404_v44 = vrot.slane %v2194_v43, 1  ;;  %v797_v45 = vrot.slane %v2194_v43, 2  ;;  %v1653_v46 = vpop.f32.mrb[13].mxu0 }
 0x186   :  { %v405_v47 = vsel %vm392_vm4, %v402_v38, %v404_v44  ;;  %v2201_v48 = vsel %vm212_vm1, %v795_v39, %v797_v45 }
 0x187   :  { %v2203_v49 = vpop.f32.mrb[14].mxu0  ;;  %1699 = vmatmul.mubr.msk.f32.gmra.mrb[38].mxu0 %vm426_vm9, %v405_v47 }
 0x188   :  { %v406_v50 = vrot.slane %v2203_v49, 1  ;;  %v799_v51 = vrot.slane %v2203_v49, 2  ;;  %v1656_v52 = vpop.f32.mrb[15].mxu0  ;;  %1788 = vmatprep.mubr.msk.f32.mxu0 %vm1925_vm0, %v1926_v6  ;;  %vm1344_vm0 = vcmask 1041409  }
 0x18a   :  { %v407_v53 = vsel %vm392_vm4, %v404_v44, %v406_v50  ;;  %v2218_v56 = vsel %vm212_vm1, %v797_v45, %v799_v51 }
 0x18b   :  { %v2220_v57 = vpop.f32.mrb[16].mxu0  ;;  %1701 = vmatprep.mubr.msk.f32.mxu1 %vm426_vm9, %v407_v53 }
 0x18c   :  { %v408_v58 = vrot.slane %v2220_v57, 1  ;;  %v801_v6 = vrot.slane %v2220_v57, 2  ;;  %v1659_v59 = vpop.f32.mrb[17].mxu0 }
 0x18e   :  { %v409_v61 = vsel %vm392_vm4, %v406_v50, %v408_v58  ;;  %v2233_v0 = vsel %vm212_vm1, %v799_v51, %v801_v6 }
 0x18f   :  { %v2235_v2 = vpop.f32.mrb[18].mxu0  ;;  %1702 = vmatmul.mubr.msk.f32.vlgmr.msra.gmra.mrb[0].mxu1 %vm426_vm9, %v409_v61 }
 0x190   :  { %v410_v3 = vrot.slane %v2235_v2, 1  ;;  %v803_v4 = vrot.slane %v2235_v2, 2  ;;  %v1662_v5 = vpop.f32.mrb[19].mxu0  ;;  %1809 = vmatpush3.bf16.msra.mxu1 %v2143_v8 }
 0x191   :  { %1811 = vmatprep.subr.bf16.mxu1 %v1810_v60  ;;  %v1519_v5 = vld [vmem:[%s2365_s2 + $0x50] sm:$0xff] }
 0x192   :  { %v411_v10 = vsel %vm392_vm4, %v408_v58, %v410_v3  ;;  %v2243_v12 = vsel %vm212_vm1, %v801_v6, %v803_v4 }
 0x193   :  { %v2245_v13 = vpop.f32.mrb[20].mxu0  ;;  %1704 = vmatprep.mubr.msk.f32.mxu1 %vm426_vm9, %v411_v10  ;;  %v1520_v10 = vld [vmem:[%s2365_s2 + $0x58] sm:$0xff] }
 0x194   :  { %v412_v14 = vrot.slane %v2245_v13, 1  ;;  %v805_v15 = vrot.slane %v2245_v13, 2  ;;  %v1665_v16 = vpop.f32.mrb[21].mxu0  ;;  %1813 = vmatpush3.bf16.msra.mxu1 %v1810_v60 }
 0x195   :  { %1815 = vmatprep.subr.bf16.mxu1 %v1814_v7 }
 0x196   :  { %v413_v8 = vsel %vm392_vm4, %v410_v3, %v412_v14  ;;  %v2252_v17 = vsel %vm212_vm1, %v803_v4, %v805_v15 }
 0x197   :  { %v337_v20 = vpop.f32.mrb[22].mxu0  ;;  %1705 = vmatmul.mubr.msk.f32.gmra.mrb[2].mxu1 %vm426_vm9, %v413_v8 }
 0x198   :  { %v414_v21 = vrot.slane %v337_v20, 1  ;;  %v807_v22 = vrot.slane %v337_v20, 2  ;;  %v1668_v23 = vpop.f32.mrb[23].mxu0 }
 0x19a   :  { %v415_v26 = vsel %vm392_vm4, %v412_v14, %v414_v21  ;;  %v2257_v27 = vsel %vm212_vm1, %v805_v15, %v807_v22  ;;  %v1818_v15 = vpack.c.bf16 %v1520_v10, %v1519_v5 }
 0x19b   :  { %v342_v28 = vpop.f32.mrb[24].mxu0  ;;  %1707 = vmatprep.mubr.msk.f32.mxu1 %vm426_vm9, %v415_v26 }
 0x19c   :  { %v416_v29 = vrot.slane %v342_v28, 1  ;;  %v809_v32 = vrot.slane %v342_v28, 2  ;;  %v1671_v33 = vpop.f32.mrb[25].mxu0 }
 0x19e   :  { %v417_v34 = vsel %vm392_vm4, %v414_v21, %v416_v29  ;;  %v2262_v35 = vsel %vm212_vm1, %v807_v22, %v809_v32 }
 0x19f   :  { %v347_v38 = vpop.f32.mrb[26].mxu0  ;;  %1708 = vmatmul.mubr.msk.f32.gmra.mrb[4].mxu1 %vm426_vm9, %v417_v34 }
 0x1a0   :  { %v418_v39 = vrot.slane %v347_v38, 1  ;;  %v811_v40 = vrot.slane %v347_v38, 2  ;;  %v1674_v41 = vpop.f32.mrb[27].mxu0 }
 0x1a2   :  { %v419_v44 = vsel %vm392_vm4, %v416_v29, %v418_v39  ;;  %v812_v45 = vsel %vm212_vm1, %v809_v32, %v811_v40 }
 0x1a3   :  { %v352_v46 = vpop.f32.mrb[28].mxu0  ;;  %1710 = vmatprep.mubr.msk.f32.mxu1 %vm426_vm9, %v419_v44 }
 0x1a4   :  { %v420_v47 = vrot.slane %v352_v46, 1  ;;  %v813_v50 = vrot.slane %v352_v46, 2  ;;  %v1677_v51 = vpop.f32.mrb[29].mxu0 }
 0x1a6   :  { %v421_v52 = vsel %vm392_vm4, %v418_v39, %v420_v47  ;;  %v814_v53 = vsel %vm212_vm1, %v811_v40, %v813_v50 }
 0x1a7   :  { %v357_v54 = vpop.f32.mrb[30].mxu0  ;;  %1711 = vmatmul.mubr.msk.f32.gmra.mrb[6].mxu1 %vm426_vm9, %v421_v52 }
 0x1a8   :  { %v422_v55 = vrot.slane %v357_v54, 1  ;;  %v815_v58 = vrot.slane %v357_v54, 2  ;;  %v1680_v6 = vpop.f32.mrb[31].mxu0 }
 0x1aa   :  { %v423_v59 = vsel %vm392_vm4, %v420_v47, %v422_v55  ;;  %v816_v60 = vsel %vm212_vm1, %v813_v50, %v815_v58 }
 0x1ab   :  { %v362_v61 = vpop.f32.mrb[32].mxu0  ;;  %1713 = vmatprep.mubr.msk.f32.mxu1 %vm426_vm9, %v423_v59 }
 0x1ac   :  { %v424_v62 = vrot.slane %v362_v61, 1  ;;  %v817_v63 = vrot.slane %v362_v61, 2  ;;  %v1683_v3 = vpop.f32.mrb[33].mxu0 }
 0x1ae   :  { %v425_v4 = vsel %vm392_vm4, %v422_v55, %v424_v62  ;;  %v818_v14 = vsel %vm212_vm1, %v815_v58, %v817_v63  ;;  %vm1346_vm1 = vcmask 1042434  }
 0x1af   :  { %1714 = vmatmul.mubr.msk.f32.gmra.mrb[8].mxu1 %vm426_vm9, %v425_v4 }
 0x1b0   :  { %1724 = vmatprep.mubr.msk.f32.mxu1 %vm426_vm9, %v2146_v9  ;;  %v1325_v9 = vld [vmem:[#allocation2] sm:$0xff] }
 0x1b3   :  { %1725 = vmatmul.mubr.msk.f32.vlgmr.msra.gmra.mrb[10].mxu1 %vm426_vm9, %v2148_v11  ;;  %v1326_v11 = vld [vmem:[#allocation2 + $0x8] sm:$0xff] }
 0x1b4   :  { %1817 = vmatpush3.bf16.msra.mxu1 %v1814_v7  ;;  %1727 = vmatprep.mubr.msk.f32.mxu1 %vm426_vm9, %v2158_v19 }
 0x1b5   :  { %1819 = vmatprep.subr.bf16.mxu1 %v1818_v15 }
 0x1b7   :  { %1728 = vmatmul.mubr.msk.f32.gmra.mrb[12].mxu1 %vm426_vm9, %v2167_v25  ;;  %v1327_v25 = vld [vmem:[#allocation2 + $0x10] sm:$0xff] }
 0x1b8   :  { %1730 = vmatprep.mubr.msk.f32.mxu1 %vm426_vm9, %v2176_v31  ;;  %1821 = vmatpush3.bf16.msra.mxu1 %v1818_v15 }
 0x1bb   :  { %1731 = vmatmul.mubr.msk.f32.gmra.mrb[14].mxu1 %vm426_vm9, %v2185_v37 }
 0x1bc   :  { %1733 = vmatprep.mubr.msk.f32.mxu1 %vm426_vm9, %v2194_v43 }
 0x1bf   :  { %1734 = vmatmul.mubr.msk.f32.gmra.mrb[0].mxu1 %vm426_vm9, %v2203_v49 }
 0x1c0   :  { %1736 = vmatprep.mubr.msk.f32.mxu1 %vm426_vm9, %v2220_v57 }
 0x1c3   :  { %1737 = vmatmul.mubr.msk.f32.gmra.mrb[2].mxu1 %vm426_vm9, %v2235_v2 }
 0x1c4   :  { %1739 = vmatprep.mubr.msk.f32.mxu1 %vm426_vm9, %v2245_v13 }
 0x1c7   :  { %1740 = vmatmul.mubr.msk.f32.gmra.mrb[4].mxu1 %vm426_vm9, %v337_v20 }
 0x1c8   :  { %1742 = vmatprep.mubr.msk.f32.mxu1 %vm426_vm9, %v342_v28 }
 0x1cb   :  { %1743 = vmatmul.mubr.msk.f32.gmra.mrb[6].mxu1 %vm426_vm9, %v347_v38 }
 0x1cc   :  { %1745 = vmatprep.mubr.msk.f32.mxu1 %vm426_vm9, %v352_v46 }
 0x1cf   :  { %1746 = vmatmul.mubr.msk.f32.gmra.mrb[8].mxu1 %vm426_vm9, %v357_v54 }
 0x1d0   :  { %1756 = vmatprep.mubr.msk.f32.mxu1 %vm426_vm9, %v2156_v18  ;;  %v1823_v18 = vpack.c.bf16 %v1326_v11, %v1325_v9 }
 0x1d2   :  { %1824 = vmatpush3.bf16.msra.mxu0 %v1823_v18 }
 0x1d3   :  { %1757 = vmatmul.mubr.msk.f32.vlgmr.msra.gmra.mrb[10].mxu1 %vm426_vm9, %v2165_v24  ;;  %1825 = vmatprep.subr.bf16.mxu0 %v1924_v1 }
 0x1d4   :  { %1759 = vmatprep.mubr.msk.f32.mxu1 %vm426_vm9, %v2174_v30  ;;  %v1328_v30 = vld [vmem:[#allocation2 + $0x18] sm:$0xff] }
 0x1d5   :  { %v1826_v31 = vpack.c.bf16 %v1328_v30, %v1327_v25 }
 0x1d7   :  { %1760 = vmatmul.mubr.msk.f32.gmra.mrb[12].mxu1 %vm426_vm9, %v2183_v36  ;;  %1827 = vmatpush3.bf16.msra.mxu0 %v1826_v31 }
 0x1d8   :  { %1762 = vmatprep.mubr.msk.f32.mxu1 %vm426_vm9, %v2192_v42 }
 0x1db   :  { %1763 = vmatmul.mubr.msk.f32.gmra.mrb[14].mxu1 %vm426_vm9, %v2201_v48 }
 0x1dc   :  { %1765 = vmatprep.mubr.msk.f32.mxu1 %vm426_vm9, %v2218_v56 }
 0x1df   :  { %1766 = vmatmul.mubr.msk.f32.gmra.mrb[0].mxu1 %vm426_vm9, %v2233_v0 }
 0x1e0   :  { %1768 = vmatprep.mubr.msk.f32.mxu1 %vm426_vm9, %v2243_v12 }
 0x1e3   :  { %1769 = vmatmul.mubr.msk.f32.gmra.mrb[2].mxu1 %vm426_vm9, %v2252_v17 }
 0x1e4   :  { %1771 = vmatprep.mubr.msk.f32.mxu1 %vm426_vm9, %v2257_v27 }
 0x1e7   :  { %1772 = vmatmul.mubr.msk.f32.gmra.mrb[4].mxu1 %vm426_vm9, %v2262_v35 }
 0x1e8   :  { %1774 = vmatprep.mubr.msk.f32.mxu1 %vm426_vm9, %v812_v45 }
 0x1eb   :  { %1775 = vmatmul.mubr.msk.f32.gmra.mrb[6].mxu1 %vm426_vm9, %v814_v53 }
 0x1ec   :  { %1777 = vmatprep.mubr.msk.f32.mxu1 %vm426_vm9, %v816_v60 }
 0x1ef   :  { %1778 = vmatmul.mubr.msk.f32.gmra.mrb[8].mxu1 %vm426_vm9, %v818_v14 }
 0x24a   :  { %v1694_v19 = vpop.f32.mrb[34].mxu0 }
 0x24b   :  { %v525_v24 = vpop.f32.mrb[35].mxu0 }
 0x252   :  { %v1697_v36 = vpop.f32.mrb[36].mxu0 }
 0x253   :  { %v535_v37 = vpop.f32.mrb[37].mxu0 }
 0x25a   :  { %v1700_v42 = vpop.f32.mrb[38].mxu0 }
 0x25b   :  { %v545_v43 = vpop.f32.mrb[39].mxu0 }
 0x2a6   :  { %v1758_v48 = vpop.f32.mrb[10].mxu1 }
 0x2a7   :  { %v917_v49 = vpop.f32.mrb[11].mxu1 }
 0x2a8   :  { %v1832_v56 = vadd.f32 %v917_v49, %v525_v24 }
 0x2aa   :  { %v1253_v57 = vsel %vm426_vm9, %v1832_v56, -inf  ;;  %v1761_v0 = vpop.f32.mrb[12].mxu1 }
 0x2ab   :  { %v1256_v2 = vrot.slane %v1253_v57, 4  ;;  %v927_v7 = vpop.f32.mrb[13].mxu1 }
 0x2ac   :  { %v1833_v12 = vadd.f32 %v927_v7, %v535_v37 }
 0x2ad   :  { %v1257_v13 = vmax.f32 %v1253_v57, %v1256_v2 }
 0x2ae   :  { %v1262_v1 = vsel %vm426_vm9, %v1833_v12, -inf  ;;  %v1764_v16 = vpop.f32.mrb[14].mxu1 }
 0x2af   :  { %v1258_v8 = vrot.slane %v1257_v13, 2  ;;  %v1265_v17 = vrot.slane %v1262_v1, 4  ;;  %v937_v20 = vpop.f32.mrb[15].mxu1 }
 0x2b0   :  { %v1834_v21 = vadd.f32 %v937_v20, %v545_v43 }
 0x2b1   :  { %v1259_v22 = vmax.f32 %v1257_v13, %v1258_v8  ;;  %v1266_v23 = vmax.f32 %v1262_v1, %v1265_v17 }
 0x2b2   :  { %v1271_v26 = vsel %vm426_vm9, %v1834_v21, -inf  ;;  %v1767_v27 = vpop.f32.mrb[0].mxu1 }
 0x2b3   :  { %v1267_v28 = vrot.slane %v1266_v23, 2  ;;  %v1274_v29 = vrot.slane %v1271_v26, 4  ;;  %v947_v32 = vpop.f32.mrb[1].mxu1  ;;  %v1260_v33 = vrot.slane %v1259_v22, 1  ;;  %v1537_v27 = vld [vmem:[%s2367_s4] ss:$0 sm:$0xff] }
 0x2b4   :  { %v1280_v34 = vsel %vm426_vm9, %v947_v32, -inf }
 0x2b5   :  { %v1268_v35 = vmax.f32 %v1266_v23, %v1267_v28  ;;  %v1275_v38 = vmax.f32 %v1271_v26, %v1274_v29  ;;  %v1283_v39 = vrot.slane %v1280_v34, 4  ;;  %v1261_v47 = vmax.f32 %v1259_v22, %v1260_v33 }
 0x2b6   :  { %v1770_v40 = vpop.f32.mrb[2].mxu1 }
 0x2b7   :  { %v1269_v41 = vrot.slane %v1268_v35, 1  ;;  %v1276_v44 = vrot.slane %v1275_v38, 2  ;;  %v1284_v45 = vmax.f32 %v1280_v34, %v1283_v39  ;;  %v957_v46 = vpop.f32.mrb[3].mxu1 }
 0x2b8   :  { %v1289_v50 = vsel %vm426_vm9, %v957_v46, -inf }
 0x2b9   :  { %v1270_v51 = vmax.f32 %v1268_v35, %v1269_v41  ;;  %v1277_v52 = vmax.f32 %v1275_v38, %v1276_v44  ;;  %v1285_v53 = vrot.slane %v1284_v45, 2  ;;  %v1292_v54 = vrot.slane %v1289_v50, 4 }
 0x2ba   :  { %v1773_v55 = vpop.f32.mrb[4].mxu1 }
 0x2bb   :  { %v1345_v58 = vsel %vm1344_vm0, %v1270_v51, %v1261_v47  ;;  %v1278_v6 = vrot.slane %v1277_v52, 1  ;;  %v1286_v59 = vmax.f32 %v1284_v45, %v1285_v53  ;;  %v1293_v60 = vmax.f32 %v1289_v50, %v1292_v54  ;;  %v967_v61 = vpop.f32.mrb[5].mxu1 }
 0x2bc   :  { %v1298_v62 = vsel %vm426_vm9, %v967_v61, -inf }
 0x2bd   :  { %v1279_v63 = vmax.f32 %v1277_v52, %v1278_v6  ;;  %v1287_v3 = vrot.slane %v1286_v59, 1  ;;  %v1294_v4 = vrot.slane %v1293_v60, 2  ;;  %v1301_v5 = vrot.slane %v1298_v62, 4 }
 0x2be   :  { %v1776_v10 = vpop.f32.mrb[6].mxu1 }
 0x2bf   :  { %v1347_v14 = vsel %vm1346_vm1, %v1279_v63, %v1345_v58  ;;  %v1288_v15 = vmax.f32 %v1286_v59, %v1287_v3  ;;  %v1295_v9 = vmax.f32 %v1293_v60, %v1294_v4  ;;  %v1302_v11 = vmax.f32 %v1298_v62, %v1301_v5  ;;  %v977_v18 = vpop.f32.mrb[7].mxu1 }
 0x2c0   :  { %v1307_v19 = vsel %vm426_vm9, %v977_v18, -inf }
 0x2c1   :  { %v1349_v24 = vsel %vm1348_vm10, %v1288_v15, %v1347_v14  ;;  %v1296_v25 = vrot.slane %v1295_v9, 1  ;;  %v1303_v30 = vrot.slane %v1302_v11, 2  ;;  %v1310_v31 = vrot.slane %v1307_v19, 4 }
 0x2c2   :  { %v1779_v36 = vpop.f32.mrb[8].mxu1 }
 0x2c3   :  { %v1297_v37 = vmax.f32 %v1295_v9, %v1296_v25  ;;  %v1304_v42 = vmax.f32 %v1302_v11, %v1303_v30  ;;  %v1311_v43 = vmax.f32 %v1307_v19, %v1310_v31  ;;  %v987_v48 = vpop.f32.mrb[9].mxu1 }
 0x2c4   :  { %v1316_v49 = vsel %vm426_vm9, %v987_v48, -inf }
 0x2c5   :  { %v1351_v56 = vsel %vm1350_vm11, %v1297_v37, %v1349_v24  ;;  %v1305_v57 = vrot.slane %v1304_v42, 1  ;;  %v1312_v0 = vrot.slane %v1311_v43, 2  ;;  %v1319_v2 = vrot.slane %v1316_v49, 4 }
 0x2c7   :  { %v1306_v7 = vmax.f32 %v1304_v42, %v1305_v57  ;;  %v1313_v12 = vmax.f32 %v1311_v43, %v1312_v0  ;;  %v1320_v13 = vmax.f32 %v1316_v49, %v1319_v2 }
 0x2c9   :  { %v1353_v1 = vsel %vm1352_vm12, %v1306_v7, %v1351_v56  ;;  %v1314_v16 = vrot.slane %v1313_v12, 1  ;;  %v1321_v8 = vrot.slane %v1320_v13, 2 }
 0x2cb   :  { %v1315_v17 = vmax.f32 %v1313_v12, %v1314_v16  ;;  %v1322_v20 = vmax.f32 %v1320_v13, %v1321_v8 }
 0x2cd   :  { %v1355_v21 = vsel %vm1354_vm13, %v1315_v17, %v1353_v1  ;;  %v1323_v22 = vrot.slane %v1322_v20, 1 }
 0x2cf   :  { %v1324_v23 = vmax.f32 %v1322_v20, %v1323_v22 }
 0x2d1   :  { %v1357_v26 = vsel %vm1356_vm14, %v1324_v23, %v1355_v21 }
 0x2d2   :  { %1789 = vmatmul.mubr.msk.f32.vlgmr.msra.gmra.mrb[40].mxu0 %vm426_vm9, %v1357_v26 }
 0x3a5   :  { %v1426_v28 = vpop.f32.mrb[40].mxu0 }
 0x3a6   :  { %v1427_v29 = vadd.f32 %v1537_v27, %v1426_v28  ;;  %v1790_v32 = vpop.f32.mrb[41].mxu0 }
 0x3a8   :  { %1430 = vst [vmem:[#allocation5] sm:$0xff] %v1427_v29 }
 0x3a9   :  { %1905 = shalt.err (!%p1902_p12)
}
 0x3aa   :  { %s1906_s22 = scalar_lea.hbm %s2368_s5, 128 }
 0x3ab   :  { %p1907_p13 = scmp.ne.s32.totalorder %s2368_s5, %s1906_s22  ;;  %p1910_p0 = scmp.lt.u32.totalorder %s1906_s22, %s2368_s5 }
 0x3ad   :  { %p1912_p1 = pnand %p1910_p0, %p1907_p13 }
 0x3af   :  { %1915 = shalt.err (!%p1912_p1)
}
 0x3b0   :  { %1440 = dma.vmem_to_hbm [thread:$0]  %s1438_s19, 128, %s2368_s5, [#allocation4]  }
 0x3b1   :  { %1918 = dma.done.wait [#allocation4], 128  }
 0x3b2   :  { %1919 = vsyncadd [#allocation4], 4294967168 }
 0x3b3   :  { %1444 = vsyncpa [#allocation3], 1 }
 0x3b4   :  { %1445 = vsyncpa [#allocation4], 1 }

</bundles_post_ra>
